<compile_context>
chip_gen: v5e
topology: v5e:2x2
jax: 0.10.0
libtpu: 0.0.40
codegen_flags: <defaults>
</compile_context>

<pallas_src>
import jax
import jax.numpy as jnp
from jax.experimental import pallas as pl
from jax.experimental.pallas import tpu as pltpu

IN_SIZE = 11
OUT_SIZE = 1
HID = 6 * IN_SIZE  # 66
LEAKY_SLOPE = 0.01  # PyTorch nn.LeakyReLU default


def _round_up(x, m):
    return ((x + m - 1) // m) * m


def _leaky_relu(h):
    return jnp.where(h >= 0, h, LEAKY_SLOPE * h)


def winenet_kernel(
    x_ref,
    w1_ref, b1_ref,
    w2_ref, b2_ref,
    w3_ref, b3_ref,
    w4_ref, b4_ref,
    w5_ref, b5_ref,
    w6_ref, b6_ref,
    w7_ref, b7_ref,
    o_ref,
):
    """One (TB, 11) batch tile through the whole MLP + softmax."""

    def lin(h, w_ref, b_ref):
        # bf16 operands -> full-rate MXU path; f32 accumulation; f32 bias add.
        return (
            jnp.dot(h.astype(jnp.bfloat16), w_ref[...],
                    preferred_element_type=jnp.float32)
            + b_ref[...]
        )

    h = x_ref[...]                                  # (TB, 11) bf16
    h = _leaky_relu(lin(h, w1_ref, b1_ref))
    h = _leaky_relu(lin(h, w2_ref, b2_ref))
    h = _leaky_relu(lin(h, w3_ref, b3_ref))
    h = _leaky_relu(lin(h, w4_ref, b4_ref))
    # Dropout(p=0.5) -> identity (eval mode), then LeakyReLU.
    h = _leaky_relu(lin(h, w5_ref, b5_ref))
    h = _leaky_relu(lin(h, w6_ref, b6_ref))
    h = lin(h, w7_ref, b7_ref)                      # (TB, OUT_SIZE) f32

    # Softmax over dim=1 (feature axis).  With OUT_SIZE == 1 this is
    # identically 1.0, but compute the general form faithfully; the
    # reciprocal goes to the EUP slot (approx=True) and is effectively free.
    m = jnp.max(h, axis=1, keepdims=True)
    e = jnp.exp(h - m)
    denom = jnp.sum(e, axis=1, keepdims=True)
    o_ref[...] = (e * pl.reciprocal(denom, approx=True)).astype(o_ref.dtype)


def init_params(key):
    """Deterministic parameter init matching net2's layer shapes.

    Weights are stored as (in, out); biases as (1, out) so they stay 2-D
    (TPU-friendly) and broadcast over the batch dimension inside the kernel.
    """
    dims = [
        (IN_SIZE, HID),
        (HID, HID),
        (HID, HID),
        (HID, HID),
        (HID, HID),
        (HID, HID),
        (HID, OUT_SIZE),
    ]
    params = []
    for (din, dout) in dims:
        key, kw, kb = jax.random.split(key, 3)
        bound = 1.0 / jnp.sqrt(jnp.float32(din))  # same scale as torch Linear init
        w = jax.random.uniform(kw, (din, dout), jnp.float32, -bound, bound)
        b = jax.random.uniform(kb, (1, dout), jnp.float32, -bound, bound)
        params.append((w, b))
    return params


def winenet_forward(x, params, *, tb=None):
    """Batched forward.  Tiles the batch; weights stay resident in VMEM."""
    B = x.shape[0]
    if tb is None:
        # Large tiles amortize the ~0.35us per-grid-step overhead; small
        # batches collapse to a single tile.  Always a multiple of 8 sublanes.
        tb = min(1024, _round_up(max(B, 1), 8))
    tb = _round_up(tb, 8)
    b_pad = _round_up(B, tb)

    x_p = x.astype(jnp.bfloat16)        # halve HBM read of x (MXU takes bf16)
    if b_pad != B:
        x_p = jnp.pad(x_p, ((0, b_pad - B), (0, 0)))

    flat_args = [x_p]
    in_specs = [pl.BlockSpec((tb, IN_SIZE), lambda i: (i, 0))]
    for (w, b) in params:
        flat_args.append(w.astype(jnp.bfloat16))    # MXU operand
        flat_args.append(b.astype(jnp.float32))     # f32 bias add
        # Full-array blocks with constant index_maps: parameters are DMA'd
        # once and kept resident in VMEM across every grid step.
        in_specs.append(pl.BlockSpec(w.shape, lambda i: (0, 0)))
        in_specs.append(pl.BlockSpec(b.shape, lambda i: (0, 0)))

    out = pl.pallas_call(
        winenet_kernel,
        out_shape=jax.ShapeDtypeStruct((b_pad, OUT_SIZE), jnp.float32),
        grid_spec=pltpu.PrefetchScalarGridSpec(
            num_scalar_prefetch=0,
            grid=(b_pad // tb,),
            in_specs=in_specs,
            out_specs=pl.BlockSpec((tb, OUT_SIZE), lambda i: (i, 0)),
        ),
        compiler_params=pltpu.CompilerParams(
            # Batch tiles are independent -> shard across v7x's 2 TensorCores.
            dimension_semantics=("parallel",),
        ),
    )(*flat_args)
    return out[:B]


def winenet_reference(x, params):
    h = x.astype(jnp.float32)
    n = len(params)
    for i, (w, b) in enumerate(params):
        h = h @ w + b
        if i < n - 1:
            h = jnp.where(h >= 0, h, LEAKY_SLOPE * h)
    return jax.nn.softmax(h, axis=1)


if __name__ == "__main__":
    key = jax.random.PRNGKey(0)
    kx, kx2, kp = jax.random.split(key, 3)

    params = init_params(kp)

    # Case 1: small batch, single tile.
    B = 8
    x = jax.random.normal(kx, (B, IN_SIZE), jnp.float32)
    out = jax.block_until_ready(winenet_forward(x, params))
    ref = winenet_reference(x, params)
    assert out.shape == (B, OUT_SIZE), out.shape
    assert jnp.allclose(out, ref, atol=1e-3, rtol=1e-3), (out, ref)

    # Case 2: multi-step grid + batch padding (B not a multiple of the tile).
    B2 = 500
    x2 = jax.random.normal(kx2, (B2, IN_SIZE), jnp.float32)
    out2 = jax.block_until_ready(winenet_forward(x2, params, tb=128))
    ref2 = winenet_reference(x2, params)
    assert out2.shape == (B2, OUT_SIZE), out2.shape
    assert jnp.allclose(out2, ref2, atol=1e-3, rtol=1e-3), (out2, ref2)

    print("KERNEL_OK")
</pallas_src>

<mosaic_0001>
module attributes {stable_mosaic.version = 11 : i64} {
  func.func @winenet_kernel(%arg0: i32, %arg1: memref<8x11xbf16, #tpu.memory_space<vmem>>, %arg2: memref<11x66xbf16, #tpu.memory_space<vmem>>, %arg3: memref<1x66xf32, #tpu.memory_space<vmem>>, %arg4: memref<66x66xbf16, #tpu.memory_space<vmem>>, %arg5: memref<1x66xf32, #tpu.memory_space<vmem>>, %arg6: memref<66x66xbf16, #tpu.memory_space<vmem>>, %arg7: memref<1x66xf32, #tpu.memory_space<vmem>>, %arg8: memref<66x66xbf16, #tpu.memory_space<vmem>>, %arg9: memref<1x66xf32, #tpu.memory_space<vmem>>, %arg10: memref<66x66xbf16, #tpu.memory_space<vmem>>, %arg11: memref<1x66xf32, #tpu.memory_space<vmem>>, %arg12: memref<66x66xbf16, #tpu.memory_space<vmem>>, %arg13: memref<1x66xf32, #tpu.memory_space<vmem>>, %arg14: memref<66x1xbf16, #tpu.memory_space<vmem>>, %arg15: memref<1x1xf32, #tpu.memory_space<vmem>>, %arg16: memref<8x1xf32, #tpu.memory_space<vmem>>) attributes {dimension_semantics = [#tpu.dimension_semantics<parallel>], iteration_bounds = array<i64: 1>, scalar_prefetch = 0 : i64, scratch_operands = 0 : i64, tpu.core_type = #tpu.core_type<tc>, window_params = [{transform_indices = @transform_0, window_bounds = array<i64: 8, 11>}, {pipeline_mode = #tpu.pipeline_mode<synchronous>, transform_indices = @transform_1, window_bounds = array<i64: 11, 66>}, {pipeline_mode = #tpu.pipeline_mode<synchronous>, transform_indices = @transform_2, window_bounds = array<i64: 1, 66>}, {pipeline_mode = #tpu.pipeline_mode<synchronous>, transform_indices = @transform_3, window_bounds = array<i64: 66, 66>}, {pipeline_mode = #tpu.pipeline_mode<synchronous>, transform_indices = @transform_4, window_bounds = array<i64: 1, 66>}, {pipeline_mode = #tpu.pipeline_mode<synchronous>, transform_indices = @transform_5, window_bounds = array<i64: 66, 66>}, {pipeline_mode = #tpu.pipeline_mode<synchronous>, transform_indices = @transform_6, window_bounds = array<i64: 1, 66>}, {pipeline_mode = #tpu.pipeline_mode<synchronous>, transform_indices = @transform_7, window_bounds = array<i64: 66, 66>}, {pipeline_mode = #tpu.pipeline_mode<synchronous>, transform_indices = @transform_8, window_bounds = array<i64: 1, 66>}, {pipeline_mode = #tpu.pipeline_mode<synchronous>, transform_indices = @transform_9, window_bounds = array<i64: 66, 66>}, {pipeline_mode = #tpu.pipeline_mode<synchronous>, transform_indices = @transform_10, window_bounds = array<i64: 1, 66>}, {pipeline_mode = #tpu.pipeline_mode<synchronous>, transform_indices = @transform_11, window_bounds = array<i64: 66, 66>}, {pipeline_mode = #tpu.pipeline_mode<synchronous>, transform_indices = @transform_12, window_bounds = array<i64: 1, 66>}, {pipeline_mode = #tpu.pipeline_mode<synchronous>, transform_indices = @transform_13, window_bounds = array<i64: 66, 1>}, {pipeline_mode = #tpu.pipeline_mode<synchronous>, transform_indices = @transform_14, window_bounds = array<i64: 1, 1>}, {transform_indices = @transform_15, window_bounds = array<i64: 8, 1>}]} {
    %c0 = arith.constant 0 : index
    %c0_0 = arith.constant 0 : index
    %0 = vector.load %arg1[%c0, %c0_0] : memref<8x11xbf16, #tpu.memory_space<vmem>>, vector<8x11xbf16>
    %c0_1 = arith.constant 0 : index
    %c0_2 = arith.constant 0 : index
    %1 = vector.load %arg2[%c0_1, %c0_2] : memref<11x66xbf16, #tpu.memory_space<vmem>>, vector<11x66xbf16>
    %cst = arith.constant dense<0.000000e+00> : vector<8x66xf32>
    %2 = tpu.matmul %0, %1, %cst {dimension_numbers = #tpu.dot_dimension_numbers<[1], [0], [0], [1], [0, 0, 1, 1], [], []>} : vector<8x11xbf16>, vector<11x66xbf16>, vector<8x66xf32> -> vector<8x66xf32>
    %c0_3 = arith.constant 0 : index
    %c0_4 = arith.constant 0 : index
    %3 = vector.load %arg3[%c0_3, %c0_4] : memref<1x66xf32, #tpu.memory_space<vmem>>, vector<1x66xf32>
    %4 = vector.broadcast %3 : vector<1x66xf32> to vector<8x66xf32>
    %5 = arith.addf %2, %4 : vector<8x66xf32>
    %cst_5 = arith.constant 0.000000e+00 : f32
    %6 = vector.broadcast %cst_5 : f32 to vector<8x66xf32>
    %7 = arith.cmpf oge, %5, %6 : vector<8x66xf32>
    %cst_6 = arith.constant 0.00999999977 : f32
    %8 = vector.broadcast %cst_6 : f32 to vector<8x66xf32>
    %9 = arith.mulf %8, %5 : vector<8x66xf32>
    %10 = arith.select %7, %5, %9 : vector<8x66xi1>, vector<8x66xf32>
    %11 = arith.truncf %10 : vector<8x66xf32> to vector<8x66xbf16>
    %c0_7 = arith.constant 0 : index
    %c0_8 = arith.constant 0 : index
    %12 = vector.load %arg4[%c0_7, %c0_8] : memref<66x66xbf16, #tpu.memory_space<vmem>>, vector<66x66xbf16>
    %cst_9 = arith.constant dense<0.000000e+00> : vector<8x66xf32>
    %13 = tpu.matmul %11, %12, %cst_9 {dimension_numbers = #tpu.dot_dimension_numbers<[1], [0], [0], [1], [0, 0, 1, 1], [], []>} : vector<8x66xbf16>, vector<66x66xbf16>, vector<8x66xf32> -> vector<8x66xf32>
    %c0_10 = arith.constant 0 : index
    %c0_11 = arith.constant 0 : index
    %14 = vector.load %arg5[%c0_10, %c0_11] : memref<1x66xf32, #tpu.memory_space<vmem>>, vector<1x66xf32>
    %15 = vector.broadcast %14 : vector<1x66xf32> to vector<8x66xf32>
    %16 = arith.addf %13, %15 : vector<8x66xf32>
    %cst_12 = arith.constant 0.000000e+00 : f32
    %17 = vector.broadcast %cst_12 : f32 to vector<8x66xf32>
    %18 = arith.cmpf oge, %16, %17 : vector<8x66xf32>
    %cst_13 = arith.constant 0.00999999977 : f32
    %19 = vector.broadcast %cst_13 : f32 to vector<8x66xf32>
    %20 = arith.mulf %19, %16 : vector<8x66xf32>
    %21 = arith.select %18, %16, %20 : vector<8x66xi1>, vector<8x66xf32>
    %22 = arith.truncf %21 : vector<8x66xf32> to vector<8x66xbf16>
    %c0_14 = arith.constant 0 : index
    %c0_15 = arith.constant 0 : index
    %23 = vector.load %arg6[%c0_14, %c0_15] : memref<66x66xbf16, #tpu.memory_space<vmem>>, vector<66x66xbf16>
    %cst_16 = arith.constant dense<0.000000e+00> : vector<8x66xf32>
    %24 = tpu.matmul %22, %23, %cst_16 {dimension_numbers = #tpu.dot_dimension_numbers<[1], [0], [0], [1], [0, 0, 1, 1], [], []>} : vector<8x66xbf16>, vector<66x66xbf16>, vector<8x66xf32> -> vector<8x66xf32>
    %c0_17 = arith.constant 0 : index
    %c0_18 = arith.constant 0 : index
    %25 = vector.load %arg7[%c0_17, %c0_18] : memref<1x66xf32, #tpu.memory_space<vmem>>, vector<1x66xf32>
    %26 = vector.broadcast %25 : vector<1x66xf32> to vector<8x66xf32>
    %27 = arith.addf %24, %26 : vector<8x66xf32>
    %cst_19 = arith.constant 0.000000e+00 : f32
    %28 = vector.broadcast %cst_19 : f32 to vector<8x66xf32>
    %29 = arith.cmpf oge, %27, %28 : vector<8x66xf32>
    %cst_20 = arith.constant 0.00999999977 : f32
    %30 = vector.broadcast %cst_20 : f32 to vector<8x66xf32>
    %31 = arith.mulf %30, %27 : vector<8x66xf32>
    %32 = arith.select %29, %27, %31 : vector<8x66xi1>, vector<8x66xf32>
    %33 = arith.truncf %32 : vector<8x66xf32> to vector<8x66xbf16>
    %c0_21 = arith.constant 0 : index
    %c0_22 = arith.constant 0 : index
    %34 = vector.load %arg8[%c0_21, %c0_22] : memref<66x66xbf16, #tpu.memory_space<vmem>>, vector<66x66xbf16>
    %cst_23 = arith.constant dense<0.000000e+00> : vector<8x66xf32>
    %35 = tpu.matmul %33, %34, %cst_23 {dimension_numbers = #tpu.dot_dimension_numbers<[1], [0], [0], [1], [0, 0, 1, 1], [], []>} : vector<8x66xbf16>, vector<66x66xbf16>, vector<8x66xf32> -> vector<8x66xf32>
    %c0_24 = arith.constant 0 : index
    %c0_25 = arith.constant 0 : index
    %36 = vector.load %arg9[%c0_24, %c0_25] : memref<1x66xf32, #tpu.memory_space<vmem>>, vector<1x66xf32>
    %37 = vector.broadcast %36 : vector<1x66xf32> to vector<8x66xf32>
    %38 = arith.addf %35, %37 : vector<8x66xf32>
    %cst_26 = arith.constant 0.000000e+00 : f32
    %39 = vector.broadcast %cst_26 : f32 to vector<8x66xf32>
    %40 = arith.cmpf oge, %38, %39 : vector<8x66xf32>
    %cst_27 = arith.constant 0.00999999977 : f32
    %41 = vector.broadcast %cst_27 : f32 to vector<8x66xf32>
    %42 = arith.mulf %41, %38 : vector<8x66xf32>
    %43 = arith.select %40, %38, %42 : vector<8x66xi1>, vector<8x66xf32>
    %44 = arith.truncf %43 : vector<8x66xf32> to vector<8x66xbf16>
    %c0_28 = arith.constant 0 : index
    %c0_29 = arith.constant 0 : index
    %45 = vector.load %arg10[%c0_28, %c0_29] : memref<66x66xbf16, #tpu.memory_space<vmem>>, vector<66x66xbf16>
    %cst_30 = arith.constant dense<0.000000e+00> : vector<8x66xf32>
    %46 = tpu.matmul %44, %45, %cst_30 {dimension_numbers = #tpu.dot_dimension_numbers<[1], [0], [0], [1], [0, 0, 1, 1], [], []>} : vector<8x66xbf16>, vector<66x66xbf16>, vector<8x66xf32> -> vector<8x66xf32>
    %c0_31 = arith.constant 0 : index
    %c0_32 = arith.constant 0 : index
    %47 = vector.load %arg11[%c0_31, %c0_32] : memref<1x66xf32, #tpu.memory_space<vmem>>, vector<1x66xf32>
    %48 = vector.broadcast %47 : vector<1x66xf32> to vector<8x66xf32>
    %49 = arith.addf %46, %48 : vector<8x66xf32>
    %cst_33 = arith.constant 0.000000e+00 : f32
    %50 = vector.broadcast %cst_33 : f32 to vector<8x66xf32>
    %51 = arith.cmpf oge, %49, %50 : vector<8x66xf32>
    %cst_34 = arith.constant 0.00999999977 : f32
    %52 = vector.broadcast %cst_34 : f32 to vector<8x66xf32>
    %53 = arith.mulf %52, %49 : vector<8x66xf32>
    %54 = arith.select %51, %49, %53 : vector<8x66xi1>, vector<8x66xf32>
    %55 = arith.truncf %54 : vector<8x66xf32> to vector<8x66xbf16>
    %c0_35 = arith.constant 0 : index
    %c0_36 = arith.constant 0 : index
    %56 = vector.load %arg12[%c0_35, %c0_36] : memref<66x66xbf16, #tpu.memory_space<vmem>>, vector<66x66xbf16>
    %cst_37 = arith.constant dense<0.000000e+00> : vector<8x66xf32>
    %57 = tpu.matmul %55, %56, %cst_37 {dimension_numbers = #tpu.dot_dimension_numbers<[1], [0], [0], [1], [0, 0, 1, 1], [], []>} : vector<8x66xbf16>, vector<66x66xbf16>, vector<8x66xf32> -> vector<8x66xf32>
    %c0_38 = arith.constant 0 : index
    %c0_39 = arith.constant 0 : index
    %58 = vector.load %arg13[%c0_38, %c0_39] : memref<1x66xf32, #tpu.memory_space<vmem>>, vector<1x66xf32>
    %59 = vector.broadcast %58 : vector<1x66xf32> to vector<8x66xf32>
    %60 = arith.addf %57, %59 : vector<8x66xf32>
    %cst_40 = arith.constant 0.000000e+00 : f32
    %61 = vector.broadcast %cst_40 : f32 to vector<8x66xf32>
    %62 = arith.cmpf oge, %60, %61 : vector<8x66xf32>
    %cst_41 = arith.constant 0.00999999977 : f32
    %63 = vector.broadcast %cst_41 : f32 to vector<8x66xf32>
    %64 = arith.mulf %63, %60 : vector<8x66xf32>
    %65 = arith.select %62, %60, %64 : vector<8x66xi1>, vector<8x66xf32>
    %66 = arith.truncf %65 : vector<8x66xf32> to vector<8x66xbf16>
    %c0_42 = arith.constant 0 : index
    %c0_43 = arith.constant 0 : index
    %67 = vector.load %arg14[%c0_42, %c0_43] : memref<66x1xbf16, #tpu.memory_space<vmem>>, vector<66x1xbf16>
    %cst_44 = arith.constant dense<0.000000e+00> : vector<8x1xf32>
    %68 = tpu.matmul %66, %67, %cst_44 {dimension_numbers = #tpu.dot_dimension_numbers<[1], [0], [0], [1], [0, 0, 1, 1], [], []>} : vector<8x66xbf16>, vector<66x1xbf16>, vector<8x1xf32> -> vector<8x1xf32>
    %c0_45 = arith.constant 0 : index
    %c0_46 = arith.constant 0 : index
    %69 = vector.load %arg15[%c0_45, %c0_46] : memref<1x1xf32, #tpu.memory_space<vmem>>, vector<1x1xf32>
    %70 = vector.broadcast %69 : vector<1x1xf32> to vector<8x1xf32>
    %71 = arith.addf %68, %70 : vector<8x1xf32>
    %cst_47 = arith.constant dense<0xFF800000> : vector<8xf32>
    %72 = vector.multi_reduction <maximumf>, %71, %cst_47 [1] : vector<8x1xf32> to vector<8xf32>
    %73 = vector.shape_cast %72 : vector<8xf32> to vector<8x1xf32>
    %74 = arith.subf %71, %73 : vector<8x1xf32>
    %75 = math.exp %74 : vector<8x1xf32>
    %cst_48 = arith.constant dense<0.000000e+00> : vector<8xf32>
    %76 = vector.multi_reduction <add>, %75, %cst_48 [1] : vector<8x1xf32> to vector<8xf32>
    %77 = vector.shape_cast %76 : vector<8xf32> to vector<8x1xf32>
    %78 = tpu.reciprocal %77 {approx = true} : vector<8x1xf32> -> vector<8x1xf32>
    %79 = arith.mulf %75, %78 : vector<8x1xf32>
    %c0_49 = arith.constant 0 : index
    %c0_50 = arith.constant 0 : index
    %80 = vector.load %arg16[%c0_49, %c0_50] : memref<8x1xf32, #tpu.memory_space<vmem>>, vector<8x1xf32>
    tpu.vector_store %arg16[%c0_49, %c0_50], %79 {strides = array<i32>} : memref<8x1xf32, #tpu.memory_space<vmem>>, vector<8x1xf32>,
    return
  }
  func.func @transform_0(%arg0: i32) -> (i32, i32) {
    %c0_i32 = arith.constant 0 : i32
    %c0_i32_0 = arith.constant 0 : i32
    return %arg0, %c0_i32 : i32, i32
  }
  func.func @transform_1(%arg0: i32) -> (i32, i32) {
    %c0_i32 = arith.constant 0 : i32
    %c0_i32_0 = arith.constant 0 : i32
    %c0_i32_1 = arith.constant 0 : i32
    return %c0_i32, %c0_i32_0 : i32, i32
  }
  func.func @transform_2(%arg0: i32) -> (i32, i32) {
    %c0_i32 = arith.constant 0 : i32
    %c0_i32_0 = arith.constant 0 : i32
    %c0_i32_1 = arith.constant 0 : i32
    return %c0_i32, %c0_i32_0 : i32, i32
  }
  func.func @transform_3(%arg0: i32) -> (i32, i32) {
    %c0_i32 = arith.constant 0 : i32
    %c0_i32_0 = arith.constant 0 : i32
    %c0_i32_1 = arith.constant 0 : i32
    return %c0_i32, %c0_i32_0 : i32, i32
  }
  func.func @transform_4(%arg0: i32) -> (i32, i32) {
    %c0_i32 = arith.constant 0 : i32
    %c0_i32_0 = arith.constant 0 : i32
    %c0_i32_1 = arith.constant 0 : i32
    return %c0_i32, %c0_i32_0 : i32, i32
  }
  func.func @transform_5(%arg0: i32) -> (i32, i32) {
    %c0_i32 = arith.constant 0 : i32
    %c0_i32_0 = arith.constant 0 : i32
    %c0_i32_1 = arith.constant 0 : i32
    return %c0_i32, %c0_i32_0 : i32, i32
  }
  func.func @transform_6(%arg0: i32) -> (i32, i32) {
    %c0_i32 = arith.constant 0 : i32
    %c0_i32_0 = arith.constant 0 : i32
    %c0_i32_1 = arith.constant 0 : i32
    return %c0_i32, %c0_i32_0 : i32, i32
  }
  func.func @transform_7(%arg0: i32) -> (i32, i32) {
    %c0_i32 = arith.constant 0 : i32
    %c0_i32_0 = arith.constant 0 : i32
    %c0_i32_1 = arith.constant 0 : i32
    return %c0_i32, %c0_i32_0 : i32, i32
  }
  func.func @transform_8(%arg0: i32) -> (i32, i32) {
    %c0_i32 = arith.constant 0 : i32
    %c0_i32_0 = arith.constant 0 : i32
    %c0_i32_1 = arith.constant 0 : i32
    return %c0_i32, %c0_i32_0 : i32, i32
  }
  func.func @transform_9(%arg0: i32) -> (i32, i32) {
    %c0_i32 = arith.constant 0 : i32
    %c0_i32_0 = arith.constant 0 : i32
    %c0_i32_1 = arith.constant 0 : i32
    return %c0_i32, %c0_i32_0 : i32, i32
  }
  func.func @transform_10(%arg0: i32) -> (i32, i32) {
    %c0_i32 = arith.constant 0 : i32
    %c0_i32_0 = arith.constant 0 : i32
    %c0_i32_1 = arith.constant 0 : i32
    return %c0_i32, %c0_i32_0 : i32, i32
  }
  func.func @transform_11(%arg0: i32) -> (i32, i32) {
    %c0_i32 = arith.constant 0 : i32
    %c0_i32_0 = arith.constant 0 : i32
    %c0_i32_1 = arith.constant 0 : i32
    return %c0_i32, %c0_i32_0 : i32, i32
  }
  func.func @transform_12(%arg0: i32) -> (i32, i32) {
    %c0_i32 = arith.constant 0 : i32
    %c0_i32_0 = arith.constant 0 : i32
    %c0_i32_1 = arith.constant 0 : i32
    return %c0_i32, %c0_i32_0 : i32, i32
  }
  func.func @transform_13(%arg0: i32) -> (i32, i32) {
    %c0_i32 = arith.constant 0 : i32
    %c0_i32_0 = arith.constant 0 : i32
    %c0_i32_1 = arith.constant 0 : i32
    return %c0_i32, %c0_i32_0 : i32, i32
  }
  func.func @transform_14(%arg0: i32) -> (i32, i32) {
    %c0_i32 = arith.constant 0 : i32
    %c0_i32_0 = arith.constant 0 : i32
    %c0_i32_1 = arith.constant 0 : i32
    return %c0_i32, %c0_i32_0 : i32, i32
  }
  func.func @transform_15(%arg0: i32) -> (i32, i32) {
    %c0_i32 = arith.constant 0 : i32
    %c0_i32_0 = arith.constant 0 : i32
    return %arg0, %c0_i32 : i32, i32
  }
}

</mosaic_0001>

<bundles_post_ra>
// kernel: tpu_custom_call.1
= control target key start
LH: loop header
LB: loop body
LE: loop exit
PB: predicated region body
PF: predicated region fallthrough
CT: control target
= control target key end

     0   :  { %s1069_s0 = inlined_call_operand.hbm [shape: bf16[8,11], index: 0, kind: input, shape index: {}]   ;;  %s1070_s1 = inlined_call_operand.hbm [shape: bf16[11,66], index: 1, kind: input, shape index: {}]   ;;  %s1071_s2 = inlined_call_operand.vmem [shape: f32[1,66], index: 2, kind: input, shape index: {}]   ;;  %s1072_s3 = inlined_call_operand.vmem [shape: bf16[66,66], index: 3, kind: input, shape index: {}]   ;;  %s1073_s4 = inlined_call_operand.vmem [shape: f32[1,66], index: 4, kind: input, shape index: {}]   ;;  %s1074_s5 = inlined_call_operand.hbm [shape: bf16[66,66], index: 5, kind: input, shape index: {}]   ;;  %s1075_s6 = inlined_call_operand.vmem [shape: f32[1,66], index: 6, kind: input, shape index: {}]   ;;  %s1076_s7 = inlined_call_operand.hbm [shape: bf16[66,66], index: 7, kind: input, shape index: {}]   ;;  %s1077_s8 = inlined_call_operand.vmem [shape: f32[1,66], index: 8, kind: input, shape index: {}]   ;;  %s1078_s9 = inlined_call_operand.hbm [shape: bf16[66,66], index: 9, kind: input, shape index: {}]   ;;  %s1079_s10 = inlined_call_operand.vmem [shape: f32[1,66], index: 10, kind: input, shape index: {}]   ;;  %s1080_s11 = inlined_call_operand.hbm [shape: bf16[66,66], index: 11, kind: input, shape index: {}]   ;;  %s1081_s12 = inlined_call_operand.vmem [shape: f32[1,66], index: 12, kind: input, shape index: {}]   ;;  %s1082_s13 = inlined_call_operand.vmem [shape: bf16[66,1], index: 13, kind: input, shape index: {}]   ;;  %s1083_s14 = inlined_call_operand.<no memory space> [shape: f32[1,1], index: 14, kind: input, shape index: {}]   ;;  %s1084_s15 = inlined_call_operand.vmem [shape: f32[8,1], index: 15, kind: output, shape index: {}]  }
   0x1   :  { %v20_v0 = vstv %s1083_s14 }
   0x2   :  { %21 = vst [vmem:[#allocation2] sm:$0x1] %v20_v0 }
   0x3   :  { %22 = vsyncpa [#allocation4], 0 }
   0x4   :  { %23 = vsyncpa [#allocation6], 0 }
   0x5   :  { %24 = vsyncpa [#allocation9], 0  ;;  %s41_s22 = sshll.u32 %s1070_s1, 4  ;;  %s42_s22 = int_to_ptr.hbm [resolvable:$true] %s41_s22 }
   0x6   :  { %25 = vsyncpa [#allocation12], 0  ;;  %s881_s23 = smov [#allocation5]   ;;  %s75_s27 = sshll.u32 %s1076_s7, 4  ;;  %s76_s27 = int_to_ptr.hbm [resolvable:$true] %s75_s27 }
   0x7   :  { %s43_s24 = sshll.u32 %s881_s23, 4  ;;  %s882_s28 = smov 64   ;;  %s44_s24 = int_to_ptr.vmem [resolvable:$true] %s43_s24 }
   0x8   :  { %s883_s29 = smov 4   ;;  %s884_s14 = smov [#allocation8]  }
   0x9   :  { %49 = dma.hbm_to_vmem [thread:$0]  %s42_s22, 128, %s44_s24, [#allocation6], %s882_s28, %s882_s28, %s883_s29  }
   0xa   :  { %s77_s30 = sshll.u32 %s884_s14, 4  ;;  %s31_s17 = sshll.u32 %s1069_s0, 4  ;;  %s78_s30 = int_to_ptr.vmem [resolvable:$true] %s77_s30  ;;  %s32_s17 = int_to_ptr.hbm [resolvable:$true] %s31_s17 }
   0xb   :  { %83 = dma.hbm_to_vmem [thread:$0]  %s76_s27, 576, %s78_s30, [#allocation9], %s882_s28, %s882_s28, %s883_s29  }
   0xc   :  { %s60_s19 = sshll.u32 %s1074_s5, 4  ;;  %s885_s20 = smov [#allocation3]   ;;  %s61_s19 = int_to_ptr.hbm [resolvable:$true] %s60_s19 }
   0xd   :  { %s33_s21 = sshll.u32 %s885_s20, 4  ;;  %s886_s22 = smov [#allocation7]   ;;  %s34_s21 = int_to_ptr.vmem [resolvable:$true] %s33_s21 }
   0xe   :  { %36 = dma.hbm_to_vmem [thread:$0]  %s32_s17, 64, %s34_s21, [#allocation4]  }
   0xf   :  { %s62_s23 = sshll.u32 %s886_s22, 4  ;;  %s90_s0 = sshll.u32 %s1078_s9, 4  ;;  %s63_s23 = int_to_ptr.vmem [resolvable:$true] %s62_s23  ;;  %s91_s0 = int_to_ptr.hbm [resolvable:$true] %s90_s0 }
  0x10   :  { %68 = dma.hbm_to_vmem [thread:$0]  %s61_s19, 576, %s63_s23, [#allocation6], %s882_s28, %s882_s28, %s883_s29  }
  0x11   :  { %s105_s5 = sshll.u32 %s1080_s11, 4  ;;  %s887_s14 = smov [#allocation10]   ;;  %s106_s5 = int_to_ptr.hbm [resolvable:$true] %s105_s5 }
  0x12   :  { %s92_s30 = sshll.u32 %s887_s14, 4  ;;  %s888_s16 = smov [#allocation11]   ;;  %s93_s30 = int_to_ptr.vmem [resolvable:$true] %s92_s30 }
  0x13   :  { %98 = dma.hbm_to_vmem [thread:$0]  %s91_s0, 576, %s93_s30, [#allocation9], %s882_s28, %s882_s28, %s883_s29  }
  0x14   :  { %s107_s9 = sshll.u32 %s888_s16, 4  ;;  %s108_s9 = int_to_ptr.vmem [resolvable:$true] %s107_s9 }
  0x15   :  { %113 = dma.hbm_to_vmem [thread:$0]  %s106_s5, 576, %s108_s9, [#allocation12], %s882_s28, %s882_s28, %s883_s29  }
  0x16   :  { %873 = dma.done.wait [#allocation4], 64  }
  0x17   :  { %874 = vsyncadd [#allocation4], 4294967232 }
  0x18   :  { %875 = dma.done.wait [#allocation6], 704  }
  0x19   :  { %876 = vsyncadd [#allocation6], 4294966592 }
  0x1a   :  { %877 = dma.done.wait [#allocation9], 1152  }
  0x1b   :  { %878 = vsyncadd [#allocation9], 4294966144 }
  0x1c   :  { %879 = dma.done.wait [#allocation12], 576  }
  0x1d   :  { %880 = vsyncadd [#allocation12], 4294966720  ;;  %vm161_vm0 = vcmask 1044480   ;;  %vm162_vm1 = vcmask 1045504   ;;  %v889_v1 = vmov 65535   ;;  %vm229_vm2 = vcmask 1040384  }
  0x1e   :  { %v163_v2 = vsel %vm161_vm0, 4294967295, %v889_v1  ;;  %v579_v3 = vld [vmem:[#allocation5] sm:$0xf]  ;;  %v684_v4 = vld [vmem:[#allocation5] sm:$0x30]  ;;  %vm157_vm3 = vcmask 89088  }
  0x1f   :  { %v164_v5 = vsel %vm162_vm1, %v163_v2, 0  ;;  %v580_v6 = vor.u32 %v684_v4, %v579_v3  ;;  %v193_v7 = vld [vmem:[%s1072_s3 + $0x20] sm:$0x1]  ;;  %v145_v11 = vld [vmem:[#allocation3] sm:$0xf]  ;;  %v688_v13 = vld [vmem:[%s1072_s3 + $0x18] sm:$0xff] }
  0x20   :  { %v215_v8 = vunpack.c.l.b16 %v193_v7  ;;  %v687_v14 = vld [vmem:[%s1072_s3 + $0x10] sm:$0xff]  ;;  %v686_v15 = vld [vmem:[%s1072_s3 + $0x8] sm:$0xff]  ;;  %v685_v16 = vld [vmem:[%s1072_s3] sm:$0xff]  ;;  %vm225_vm5 = vcmask 539648   ;;  %vm567_vm11 = vcmask 7168  }
  0x21   :  { %v166_v9 = vand.u32 %v580_v6, %v164_v5  ;;  %v258_v17 = vld [vmem:[#allocation7 + $0x20] sm:$0x1]  ;;  %v692_v21 = vld [vmem:[#allocation7 + $0x18] sm:$0xff]  ;;  %v691_v22 = vld [vmem:[#allocation7 + $0x10] sm:$0xff] }
  0x22   :  { %v220_v10 = vpack.c.b16 %v215_v8, %v215_v8  ;;  %v280_v18 = vunpack.c.l.b16 %v258_v17  ;;  %v718_v23 = vld [vmem:[%s1071_s2] ss:$0 sm:$0xff]  ;;  %v690_v30 = vld [vmem:[#allocation7 + $0x8] sm:$0xff]  ;;  %v689_v31 = vld [vmem:[#allocation7] sm:$0xff] }
  0x23   :  { %175 = vmatpush.bf16.msra.mxu0 %v166_v9  ;;  %v321_v32 = vld [vmem:[#allocation8 + $0x20] sm:$0x1]  ;;  %v696_v36 = vld [vmem:[#allocation8 + $0x18] sm:$0xff]  ;;  %v695_v37 = vld [vmem:[#allocation8 + $0x10] sm:$0xff] }
  0x24   :  { %v231_v12 = vsel %vm229_vm2, %v220_v10, 0  ;;  %v285_v19 = vpack.c.b16 %v280_v18, %v280_v18  ;;  %v343_v33 = vunpack.c.l.b16 %v321_v32  ;;  %v719_v38 = vld [vmem:[%s1073_s4] ss:$0 sm:$0xff]  ;;  %v693_v46 = vld [vmem:[#allocation8] sm:$0xff]  ;;  %v699_v52 = vld [vmem:[#allocation10 + $0x10] sm:$0xff] }
  0x25   :  { %236 = vmatpush.bf16.msra.mxu1 %v231_v12  ;;  %v694_v45 = vld [vmem:[#allocation8 + $0x8] sm:$0xff]  ;;  %v384_v47 = vld [vmem:[#allocation10 + $0x20] sm:$0x1]  ;;  %v700_v51 = vld [vmem:[#allocation10 + $0x18] sm:$0xff] }
  0x26   :  { %581 = vmatmul.msk.bf16.vlgmr.msra.gmra.mxu0 %vm157_vm3, %v145_v11  ;;  %v294_v20 = vsel %vm229_vm2, %v285_v19, 0  ;;  %v348_v34 = vpack.c.b16 %v343_v33, %v343_v33  ;;  %v406_v48 = vunpack.c.l.b16 %v384_v47  ;;  %v720_v53 = vld [vmem:[%s1075_s6] ss:$0 sm:$0xff]  ;;  %v697_v61 = vld [vmem:[#allocation10] sm:$0xff]  ;;  %v703_v3 = vld [vmem:[#allocation11 + $0x10] sm:$0xff] }
  0x27   :  { %299 = vmatpush.bf16.msra.mxu2 %v294_v20  ;;  %v698_v60 = vld [vmem:[#allocation10 + $0x8] sm:$0xff]  ;;  %v447_v62 = vld [vmem:[#allocation11 + $0x20] sm:$0x1]  ;;  %v704_v2 = vld [vmem:[#allocation11 + $0x18] sm:$0xff] }
  0x28   :  { %v357_v35 = vsel %vm229_vm2, %v348_v34, 0  ;;  %v411_v49 = vpack.c.b16 %v406_v48, %v406_v48  ;;  %v469_v63 = vunpack.c.l.b16 %v447_v62  ;;  %v721_v4 = vld [vmem:[%s1077_s8] ss:$0 sm:$0xff]  ;;  %v702_v11 = vld [vmem:[#allocation11 + $0x8] sm:$0xff]  ;;  %v708_v17 = vld [vmem:[%s1082_s13 + $0x18] sm:$0xff] }
  0x29   :  { %237 = vmatpush.bf16.msra.mxu1 %v688_v13  ;;  %362 = vmatpush.bf16.msra.mxu3 %v357_v35  ;;  %v701_v12 = vld [vmem:[#allocation11] sm:$0xff]  ;;  %v707_v18 = vld [vmem:[%s1082_s13 + $0x10] sm:$0xff] }
  0x2a   :  { %v420_v50 = vsel %vm229_vm2, %v411_v49, 0  ;;  %v474_v0 = vpack.c.b16 %v469_v63, %v469_v63  ;;  %v510_v13 = vld [vmem:[%s1082_s13 + $0x20] sm:$0x1] }
  0x2b   :  { %300 = vmatpush.bf16.msra.mxu2 %v692_v21  ;;  %425 = vmatpush.bf16.msrb.mxu0 %v420_v50  ;;  %v722_v19 = vld [vmem:[%s1079_s10] ss:$0 sm:$0xff] }
  0x2c   :  { %v483_v1 = vsel %vm229_vm2, %v474_v0, 0  ;;  %v724_v35 = vld [vmem:[#allocation2] ss:$0 sm:$0xff] }
  0x2d   :  { %238 = vmatpush.bf16.msra.mxu1 %v687_v14  ;;  %363 = vmatpush.bf16.msra.mxu3 %v696_v36  ;;  %v532_v14 = vunpack.c.l.b16 %v510_v13 }
  0x2f   :  { %301 = vmatpush.bf16.msra.mxu2 %v691_v22  ;;  %426 = vmatpush.bf16.msrb.mxu0 %v700_v51 }
  0x31   :  { %239 = vmatpush.bf16.msra.mxu1 %v686_v15  ;;  %364 = vmatpush.bf16.msra.mxu3 %v695_v37  ;;  %v537_v15 = vpack.c.b16 %v532_v14, %v532_v14 }
  0x33   :  { %302 = vmatpush.bf16.msra.mxu2 %v690_v30  ;;  %427 = vmatpush.bf16.msrb.mxu0 %v699_v52 }
  0x35   :  { %240 = vmatpush.bf16.msra.mxu1 %v685_v16  ;;  %365 = vmatpush.bf16.msra.mxu3 %v694_v45  ;;  %v546_v16 = vsel %vm229_vm2, %v537_v15, 0 }
  0x37   :  { %303 = vmatpush.bf16.msra.mxu2 %v689_v31  ;;  %428 = vmatpush.bf16.msrb.mxu0 %v698_v60 }
  0x39   :  { %366 = vmatpush.bf16.msra.mxu3 %v693_v46  ;;  %488 = vmatpush.bf16.msrb.mxu1 %v483_v1 }
  0x3b   :  { %429 = vmatpush.bf16.msrb.mxu0 %v697_v61  ;;  %551 = vmatpush.bf16.msrb.mxu2 %v546_v16 }
  0x3d   :  { %489 = vmatpush.bf16.msrb.mxu1 %v704_v2 }
  0x3f   :  { %552 = vmatpush.bf16.msrb.mxu2 %v708_v17 }
  0x41   :  { %490 = vmatpush.bf16.msrb.mxu1 %v703_v3 }
  0x43   :  { %553 = vmatpush.bf16.msrb.mxu2 %v707_v18 }
  0x45   :  { %491 = vmatpush.bf16.msrb.mxu1 %v702_v11 }
  0x49   :  { %492 = vmatpush.bf16.msrb.mxu1 %v701_v12 }
  0xa3   :  { %v177_v24 = vpop.f32.mrf.mxu0 }
  0xa4   :  { %v178_v25 = vadd.f32 %v718_v23, %v177_v24 }
  0xa6   :  { %vm181_vm4 = vcmp.ge.f32.partialorder %v178_v25, 0.0  ;;  %v182_v26 = vmul.f32 0.01, %v178_v25 }
  0xa8   :  { %v183_v27 = vsel %vm181_vm4, %v178_v25, %v182_v26  ;;  %v706_v26 = vld [vmem:[%s1082_s13 + $0x8] sm:$0xff] }
  0xa9   :  { %v184_v28 = vpack.c.bf16 %v183_v27, %v183_v27  ;;  %554 = vmatpush.bf16.msrb.mxu2 %v706_v26  ;;  %v705_v27 = vld [vmem:[%s1082_s13] sm:$0xff] }
  0xab   :  { %v179_v29 = vpop.f32.mrf.mxu0  ;;  %598 = vmatmul.msk.bf16.vlgmr.msra.gmra.mxu1 %vm225_vm5, %v184_v28  ;;  %v723_v28 = vld [vmem:[%s1081_s12] ss:$0 sm:$0xff] }
  0xad   :  { %555 = vmatpush.bf16.msrb.mxu2 %v705_v27 }
 0x128   :  { %v242_v39 = vpop.f32.mrf.mxu1 }
 0x129   :  { %v243_v40 = vadd.f32 %v719_v38, %v242_v39 }
 0x12b   :  { %vm246_vm6 = vcmp.ge.f32.partialorder %v243_v40, 0.0  ;;  %v247_v41 = vmul.f32 0.01, %v243_v40 }
 0x12d   :  { %v248_v42 = vsel %vm246_vm6, %v243_v40, %v247_v41 }
 0x12e   :  { %v249_v43 = vpack.c.bf16 %v248_v42, %v248_v42 }
 0x130   :  { %v244_v44 = vpop.f32.mrf.mxu1  ;;  %615 = vmatmul.msk.bf16.vlgmr.msra.gmra.mxu2 %vm225_vm5, %v249_v43 }
 0x1b3   :  { %v305_v54 = vpop.f32.mrf.mxu2 }
 0x1b4   :  { %v306_v55 = vadd.f32 %v720_v53, %v305_v54 }
 0x1b6   :  { %vm309_vm7 = vcmp.ge.f32.partialorder %v306_v55, 0.0  ;;  %v310_v56 = vmul.f32 0.01, %v306_v55 }
 0x1b8   :  { %v311_v57 = vsel %vm309_vm7, %v306_v55, %v310_v56 }
 0x1b9   :  { %v312_v58 = vpack.c.bf16 %v311_v57, %v311_v57 }
 0x1bb   :  { %v307_v59 = vpop.f32.mrf.mxu2  ;;  %632 = vmatmul.msk.bf16.vlgmr.msra.gmra.mxu3 %vm225_vm5, %v312_v58 }
 0x23e   :  { %v368_v5 = vpop.f32.mrf.mxu3 }
 0x23f   :  { %v369_v6 = vadd.f32 %v721_v4, %v368_v5 }
 0x241   :  { %vm372_vm8 = vcmp.ge.f32.partialorder %v369_v6, 0.0  ;;  %v373_v7 = vmul.f32 0.01, %v369_v6 }
 0x243   :  { %v374_v8 = vsel %vm372_vm8, %v369_v6, %v373_v7 }
 0x244   :  { %v375_v9 = vpack.c.bf16 %v374_v8, %v374_v8 }
 0x246   :  { %v370_v10 = vpop.f32.mrf.mxu3  ;;  %649 = vmatmul.msk.bf16.vlgmr.msrb.gmra.mxu0 %vm225_vm5, %v375_v9 }
 0x2c3   :  { %v431_v20 = vpop.f32.mrf.mxu0 }
 0x2c4   :  { %v432_v21 = vadd.f32 %v722_v19, %v431_v20 }
 0x2c6   :  { %vm435_vm9 = vcmp.ge.f32.partialorder %v432_v21, 0.0  ;;  %v436_v22 = vmul.f32 0.01, %v432_v21 }
 0x2c8   :  { %v437_v23 = vsel %vm435_vm9, %v432_v21, %v436_v22 }
 0x2c9   :  { %v438_v24 = vpack.c.bf16 %v437_v23, %v437_v23 }
 0x2cb   :  { %v433_v25 = vpop.f32.mrf.mxu0  ;;  %666 = vmatmul.msk.bf16.vlgmr.msrb.gmra.mxu1 %vm225_vm5, %v438_v24 }
 0x348   :  { %v494_v29 = vpop.f32.mrf.mxu1 }
 0x349   :  { %v495_v30 = vadd.f32 %v723_v28, %v494_v29 }
 0x34b   :  { %vm498_vm10 = vcmp.ge.f32.partialorder %v495_v30, 0.0  ;;  %v499_v31 = vmul.f32 0.01, %v495_v30 }
 0x34d   :  { %v500_v32 = vsel %vm498_vm10, %v495_v30, %v499_v31 }
 0x34e   :  { %v501_v33 = vpack.c.bf16 %v500_v32, %v500_v32 }
 0x350   :  { %v496_v34 = vpop.f32.mrf.mxu1  ;;  %683 = vmatmul.msk.bf16.vlgmr.msrb.gmra.mxu2 %vm225_vm5, %v501_v33 }
 0x3d3   :  { %v557_v36 = vpop.f32.mrf.mxu2 }
 0x3d4   :  { %v558_v37 = vadd.f32 %v724_v35, %v557_v36 }
 0x3d6   :  { %v561_v38 = vsub.f32 %v558_v37, %v558_v37 }
 0x3d8   :  { %v562_v39 = vmul.f32 1.442695, %v561_v38 }
 0x3da   :  { %725 = vpow2.f32 %v562_v39 }
 0x3db   :  { %v559_v40 = vpop.f32.mrf.mxu2 }
 0x3e0   :  { %v726_v41 = vpop.eup %725 }
 0x3e1   :  { %727 = vrcp.f32 %v726_v41 }
 0x3e7   :  { %v728_v42 = vpop.eup %727 }
 0x3e8   :  { %v566_v43 = vmul.f32 %v728_v42, %v726_v41 }
 0x3ea   :  { %568 = vst.msk [vmem:[%s1084_s15] sm:$0xff] %vm567_vm11, %v566_v43 }
 0x3eb   :  { %573 = vsyncpa [#allocation4], 1 }
 0x3ec   :  { %574 = vsyncpa [#allocation6], 1 }
 0x3ed   :  { %575 = vsyncpa [#allocation9], 1 }
 0x3ee   :  { %576 = vsyncpa [#allocation12], 1 }

</bundles_post_ra>
